<compile_context>
chip_gen: v7x
topology: tpu7x:2x2x1
jax: 0.10.0
libtpu: 0.0.40
codegen_flags: <defaults>
</compile_context>

<pallas_src>
import math
import functools

import jax
import jax.numpy as jnp
from jax.experimental import pallas as pl
from jax.experimental.pallas import tpu as pltpu


def _dual_lstm_kernel(vs_ref, vh_ref, vc_ref, as_ref, ah_ref, ac_ref,
                      wvs_ref, wvh_ref, was_ref, wah_ref, b_ref,
                      out_ref, *, hidden_dim):
    """Fused dual-modality LSTM-cell update.

    vs_ref: [B, Dv]     visual_state          vh_ref: [B, H]  visual_hidden
    vc_ref: [B, H]      visual_cell
    as_ref: [B, Da]     audio_state           ah_ref: [B, H]  audio_hidden
    ac_ref: [B, H]      audio_cell
    wvs/wvh/was/wah:    [Din, 8H] block-column fused weights (gate layout
                        [i_v|i_a|f_v|f_a|c_v|c_a|o_v|o_a], i/f/o pre-scaled 0.5)
    b_ref:  [1, 8H]     combined bias (same layout/scaling, f32)
    out_ref:[B, 4H]     lane-dense slab [v_out | a_out | v_cell | a_cell], f32
    """
    H = hidden_dim
    w_dtype = wvs_ref.dtype

    def mm(x_ref, w_ref):
        x = x_ref[...]
        if x.dtype != w_dtype:
            x = x.astype(w_dtype)
        return jnp.dot(x, w_ref[...], preferred_element_type=jnp.float32)

    # Four accumulating MXU dots into one [B, 8H] gates slab. Visual inputs
    # only feed the visual gate columns and audio inputs the audio columns
    # (block-diagonal GEMM without any wrapper- or kernel-side concat of x/h).
    gates = (mm(vs_ref, wvs_ref) + mm(vh_ref, wvh_ref)
             + mm(as_ref, was_ref) + mm(ah_ref, wah_ref)
             + b_ref[...])                                  # [B, 8H] f32

    # Single full-slab transcendental; i/f/o columns were pre-scaled by 0.5,
    # so sigmoid(g_ifo) = 0.5 * tanh(g_ifo / 2) + 0.5 (one VPU fma).
    t = jnp.tanh(gates)
    s = 0.5 * t + 0.5

    # Gate layout [i_v|i_a|f_v|f_a|c_v|c_a|o_v|o_a]: both modalities stay
    # lane-packed ([B, 2H] slabs) through the whole cell update.
    i_g = s[:, 0 * H:2 * H]
    f_g = s[:, 2 * H:4 * H]
    c_g = t[:, 4 * H:6 * H]
    o_g = s[:, 6 * H:8 * H]

    c_prev = jnp.concatenate(
        [vc_ref[...].astype(jnp.float32), ac_ref[...].astype(jnp.float32)],
        axis=1)                                             # [B, 2H]
    c_new = f_g * c_prev + i_g * c_g                        # [B, 2H]
    out = o_g * jnp.tanh(c_new)                             # [B, 2H]

    # One unmasked, lane-dense [B, 4H] store: [v_out | a_out | v_cell | a_cell].
    out_ref[...] = jnp.concatenate([out, c_new], axis=1).astype(out_ref.dtype)


def _pick_block_b(batch):
    for cand in (512, 256, 128, 64, 32, 16, 8):
        if batch % cand == 0:
            return cand
    return batch  # non-multiple-of-8 batch -> single full block


def _run_dual_lstm(vs, vh, vc, as_, ah, ac, wvs, wvh, was, wah, b, hidden_dim):
    B = vs.shape[0]
    H = hidden_dim
    block_b = _pick_block_b(B)
    grid = (pl.cdiv(B, block_b),)

    def batch_spec(width):
        return pl.BlockSpec((block_b, width), lambda i: (i, 0))

    def full_spec(arr):
        return pl.BlockSpec(arr.shape, lambda i: (0, 0))

    kernel = functools.partial(_dual_lstm_kernel, hidden_dim=H)
    return pl.pallas_call(
        kernel,
        out_shape=jax.ShapeDtypeStruct((B, 4 * H), jnp.float32),
        grid=grid,
        in_specs=[batch_spec(vs.shape[1]), batch_spec(H), batch_spec(H),
                  batch_spec(as_.shape[1]), batch_spec(H), batch_spec(H),
                  full_spec(wvs), full_spec(wvh), full_spec(was),
                  full_spec(wah), full_spec(b)],
        out_specs=pl.BlockSpec((block_b, 4 * H), lambda i: (i, 0)),
        compiler_params=pltpu.CompilerParams(
            dimension_semantics=("parallel",)),  # lets v7x split batch on 2 TCs
    )(vs, vh, vc, as_, ah, ac, wvs, wvh, was, wah, b)


class DualLSTMCellPallas:
    """JAX/Pallas re-implementation of Dual_lstm_cell (forward pass)."""

    def __init__(self, visual_input_dim, audio_input_dim, hidden_dim,
                 alph=0.5, key=None, dtype=jnp.float32, mxu_dtype=None):
        self.visual_input_dim = visual_input_dim
        self.audio_input_dim = audio_input_dim
        self.hidden_dim = hidden_dim
        self.alph = alph  # unused in forward (matches the PyTorch module)
        H = hidden_dim
        std = 1.0 / math.sqrt(H)
        if key is None:
            key = jax.random.PRNGKey(0)

        def uni(k, shape):
            return jax.random.uniform(k, shape, dtype=dtype, minval=-std, maxval=std)

        ks = jax.random.split(key, 8)
        # torch Linear weight shape is [out, in]; store transposed [in, out].
        self.vs_w = uni(ks[0], (visual_input_dim, 4 * H))
        self.vs_b = uni(ks[1], (1, 4 * H))
        self.vh_w = uni(ks[2], (H, 4 * H))
        self.vh_b = uni(ks[3], (1, 4 * H))
        self.as2_w = uni(ks[4], (audio_input_dim, 4 * H))
        self.as2_b = uni(ks[5], (1, 4 * H))
        self.ah2_w = uni(ks[6], (H, 4 * H))
        self.ah2_b = uni(ks[7], (1, 4 * H))

        # mxu_dtype=jnp.bfloat16 uses the native bf16 MXU on v6e/v7x (halves
        # weight DMA bytes); default f32 keeps exact parity with PyTorch.
        w_dtype = jnp.float32 if mxu_dtype is None else mxu_dtype

        def expand(w4, modality):
            # Reorder [i|f|c|o] (width 4H) into the fused 8H layout
            # [i_v|i_a|f_v|f_a|c_v|c_a|o_v|o_a], pre-scaling i/f/o by 0.5 so
            # the kernel recovers sigmoid(g) = 0.5 * tanh(g/2) + 0.5.
            i, f, c, o = (w4[:, k * H:(k + 1) * H] for k in range(4))
            z = jnp.zeros_like(i)
            if modality == "v":
                blocks = [0.5 * i, z, 0.5 * f, z, c, z, 0.5 * o, z]
            else:
                blocks = [z, 0.5 * i, z, 0.5 * f, z, c, z, 0.5 * o]
            return jnp.concatenate(blocks, axis=1)

        self.w_vs = expand(self.vs_w, "v").astype(w_dtype)
        self.w_vh = expand(self.vh_w, "v").astype(w_dtype)
        self.w_as = expand(self.as2_w, "a").astype(w_dtype)
        self.w_ah = expand(self.ah2_w, "a").astype(w_dtype)
        # Combined bias (same layout / scaling), kept f32 (added post-dot).
        self.b_all = (expand(self.vs_b + self.vh_b, "v")
                      + expand(self.as2_b + self.ah2_b, "a")).astype(jnp.float32)

    def __call__(self, visual_state, visual_hidden, visual_cell,
                 audio_state, audio_hidden, audio_cell):
        H = self.hidden_dim
        slab = _run_dual_lstm(
            visual_state, visual_hidden, visual_cell,
            audio_state, audio_hidden, audio_cell,
            self.w_vs, self.w_vh, self.w_as, self.w_ah, self.b_all, H)
        # Slab layout: [v_out | a_out | v_cell | a_cell], f32 (cell state is
        # kept in f32 so a bf16 model never truncates the recurrent cell).
        v_out = slab[:, 0 * H:1 * H]
        a_out = slab[:, 1 * H:2 * H]
        v_cell = slab[:, 2 * H:3 * H]
        a_cell = slab[:, 3 * H:4 * H]
        return v_out, v_cell, a_out, a_cell

    # Pure-JAX reference (uses the raw, un-fused, un-scaled weights).
    def reference(self, vs, vh, vc, as_, ah, ac):
        H = self.hidden_dim

        def cell(x, h, c, wx, bx, wh, bh):
            g = x @ wx + bx + h @ wh + bh
            i = jax.nn.sigmoid(g[:, 0:H])
            f = jax.nn.sigmoid(g[:, H:2 * H])
            cg = jnp.tanh(g[:, 2 * H:3 * H])
            o = jax.nn.sigmoid(g[:, 3 * H:4 * H])
            cn = f * c + i * cg
            return o * jnp.tanh(cn), cn

        vo, vcn = cell(vs, vh, vc, self.vs_w, self.vs_b, self.vh_w, self.vh_b)
        ao, acn = cell(as_, ah, ac, self.as2_w, self.as2_b, self.ah2_w, self.ah2_b)
        return vo, vcn, ao, acn


if __name__ == "__main__":
    B = 8
    VISUAL_DIM = 16
    AUDIO_DIM = 12
    HIDDEN = 32

    key = jax.random.PRNGKey(0)
    k_params, k_in = jax.random.split(key)
    cell = DualLSTMCellPallas(VISUAL_DIM, AUDIO_DIM, HIDDEN, key=k_params)

    ks = jax.random.split(k_in, 6)
    visual_state = jax.random.normal(ks[0], (B, VISUAL_DIM), jnp.float32)
    visual_hidden = jax.random.normal(ks[1], (B, HIDDEN), jnp.float32)
    visual_cell = jax.random.normal(ks[2], (B, HIDDEN), jnp.float32)
    audio_state = jax.random.normal(ks[3], (B, AUDIO_DIM), jnp.float32)
    audio_hidden = jax.random.normal(ks[4], (B, HIDDEN), jnp.float32)
    audio_cell = jax.random.normal(ks[5], (B, HIDDEN), jnp.float32)

    outs = cell(visual_state, visual_hidden, visual_cell,
                audio_state, audio_hidden, audio_cell)
    outs = jax.block_until_ready(outs)

    refs = cell.reference(visual_state, visual_hidden, visual_cell,
                          audio_state, audio_hidden, audio_cell)
    for got, want in zip(outs, refs):
        assert got.shape == want.shape
        assert jnp.allclose(got, want, atol=2e-5, rtol=2e-5)

    print("KERNEL_OK")
</pallas_src>

<mosaic_0001>
module attributes {stable_mosaic.version = 11 : i64} {
  func.func @_dual_lstm_kernel(%arg0: i32, %arg1: memref<8x16xf32, #tpu.memory_space<vmem>>, %arg2: memref<8x32xf32, #tpu.memory_space<vmem>>, %arg3: memref<8x32xf32, #tpu.memory_space<vmem>>, %arg4: memref<8x12xf32, #tpu.memory_space<vmem>>, %arg5: memref<8x32xf32, #tpu.memory_space<vmem>>, %arg6: memref<8x32xf32, #tpu.memory_space<vmem>>, %arg7: memref<16x256xf32, #tpu.memory_space<vmem>>, %arg8: memref<32x256xf32, #tpu.memory_space<vmem>>, %arg9: memref<12x256xf32, #tpu.memory_space<vmem>>, %arg10: memref<32x256xf32, #tpu.memory_space<vmem>>, %arg11: memref<1x256xf32, #tpu.memory_space<vmem>>, %arg12: memref<8x128xf32, #tpu.memory_space<vmem>>) attributes {dimension_semantics = [#tpu.dimension_semantics<parallel>], iteration_bounds = array<i64: 1>, scalar_prefetch = 0 : i64, scratch_operands = 0 : i64, tpu.core_type = #tpu.core_type<tc>, window_params = [{transform_indices = @transform_0, window_bounds = array<i64: 8, 16>}, {transform_indices = @transform_1, window_bounds = array<i64: 8, 32>}, {transform_indices = @transform_2, window_bounds = array<i64: 8, 32>}, {transform_indices = @transform_3, window_bounds = array<i64: 8, 12>}, {transform_indices = @transform_4, window_bounds = array<i64: 8, 32>}, {transform_indices = @transform_5, window_bounds = array<i64: 8, 32>}, {pipeline_mode = #tpu.pipeline_mode<synchronous>, transform_indices = @transform_6, window_bounds = array<i64: 16, 256>}, {pipeline_mode = #tpu.pipeline_mode<synchronous>, transform_indices = @transform_7, window_bounds = array<i64: 32, 256>}, {pipeline_mode = #tpu.pipeline_mode<synchronous>, transform_indices = @transform_8, window_bounds = array<i64: 12, 256>}, {pipeline_mode = #tpu.pipeline_mode<synchronous>, transform_indices = @transform_9, window_bounds = array<i64: 32, 256>}, {pipeline_mode = #tpu.pipeline_mode<synchronous>, transform_indices = @transform_10, window_bounds = array<i64: 1, 256>}, {transform_indices = @transform_11, window_bounds = array<i64: 8, 128>}]} {
    %c0 = arith.constant 0 : index
    %c0_0 = arith.constant 0 : index
    %0 = vector.load %arg1[%c0, %c0_0] : memref<8x16xf32, #tpu.memory_space<vmem>>, vector<8x16xf32>
    %c0_1 = arith.constant 0 : index
    %c0_2 = arith.constant 0 : index
    %1 = vector.load %arg7[%c0_1, %c0_2] : memref<16x256xf32, #tpu.memory_space<vmem>>, vector<16x256xf32>
    %cst = arith.constant dense<0.000000e+00> : vector<8x256xf32>
    %2 = tpu.matmul %0, %1, %cst {dimension_numbers = #tpu.dot_dimension_numbers<[1], [0], [0], [1], [0, 0, 1, 1], [], []>} : vector<8x16xf32>, vector<16x256xf32>, vector<8x256xf32> -> vector<8x256xf32>
    %c0_3 = arith.constant 0 : index
    %c0_4 = arith.constant 0 : index
    %3 = vector.load %arg2[%c0_3, %c0_4] : memref<8x32xf32, #tpu.memory_space<vmem>>, vector<8x32xf32>
    %c0_5 = arith.constant 0 : index
    %c0_6 = arith.constant 0 : index
    %4 = vector.load %arg8[%c0_5, %c0_6] : memref<32x256xf32, #tpu.memory_space<vmem>>, vector<32x256xf32>
    %cst_7 = arith.constant dense<0.000000e+00> : vector<8x256xf32>
    %5 = tpu.matmul %3, %4, %cst_7 {dimension_numbers = #tpu.dot_dimension_numbers<[1], [0], [0], [1], [0, 0, 1, 1], [], []>} : vector<8x32xf32>, vector<32x256xf32>, vector<8x256xf32> -> vector<8x256xf32>
    %6 = arith.addf %2, %5 : vector<8x256xf32>
    %c0_8 = arith.constant 0 : index
    %c0_9 = arith.constant 0 : index
    %7 = vector.load %arg4[%c0_8, %c0_9] : memref<8x12xf32, #tpu.memory_space<vmem>>, vector<8x12xf32>
    %c0_10 = arith.constant 0 : index
    %c0_11 = arith.constant 0 : index
    %8 = vector.load %arg9[%c0_10, %c0_11] : memref<12x256xf32, #tpu.memory_space<vmem>>, vector<12x256xf32>
    %cst_12 = arith.constant dense<0.000000e+00> : vector<8x256xf32>
    %9 = tpu.matmul %7, %8, %cst_12 {dimension_numbers = #tpu.dot_dimension_numbers<[1], [0], [0], [1], [0, 0, 1, 1], [], []>} : vector<8x12xf32>, vector<12x256xf32>, vector<8x256xf32> -> vector<8x256xf32>
    %10 = arith.addf %6, %9 : vector<8x256xf32>
    %c0_13 = arith.constant 0 : index
    %c0_14 = arith.constant 0 : index
    %11 = vector.load %arg5[%c0_13, %c0_14] : memref<8x32xf32, #tpu.memory_space<vmem>>, vector<8x32xf32>
    %c0_15 = arith.constant 0 : index
    %c0_16 = arith.constant 0 : index
    %12 = vector.load %arg10[%c0_15, %c0_16] : memref<32x256xf32, #tpu.memory_space<vmem>>, vector<32x256xf32>
    %cst_17 = arith.constant dense<0.000000e+00> : vector<8x256xf32>
    %13 = tpu.matmul %11, %12, %cst_17 {dimension_numbers = #tpu.dot_dimension_numbers<[1], [0], [0], [1], [0, 0, 1, 1], [], []>} : vector<8x32xf32>, vector<32x256xf32>, vector<8x256xf32> -> vector<8x256xf32>
    %14 = arith.addf %10, %13 : vector<8x256xf32>
    %c0_18 = arith.constant 0 : index
    %c0_19 = arith.constant 0 : index
    %15 = vector.load %arg11[%c0_18, %c0_19] : memref<1x256xf32, #tpu.memory_space<vmem>>, vector<1x256xf32>
    %16 = vector.broadcast %15 : vector<1x256xf32> to vector<8x256xf32>
    %17 = arith.addf %14, %16 : vector<8x256xf32>
    %18 = math.tanh %17 : vector<8x256xf32>
    %cst_20 = arith.constant 5.000000e-01 : f32
    %19 = vector.broadcast %cst_20 : f32 to vector<8x256xf32>
    %20 = arith.mulf %19, %18 : vector<8x256xf32>
    %cst_21 = arith.constant 5.000000e-01 : f32
    %21 = vector.broadcast %cst_21 : f32 to vector<8x256xf32>
    %22 = arith.addf %20, %21 : vector<8x256xf32>
    %23 = vector.extract_strided_slice %22 {offsets = [0, 0], sizes = [8, 64], strides = [1, 1]} : vector<8x256xf32> to vector<8x64xf32>
    %24 = vector.extract_strided_slice %22 {offsets = [0, 64], sizes = [8, 64], strides = [1, 1]} : vector<8x256xf32> to vector<8x64xf32>
    %25 = vector.extract_strided_slice %18 {offsets = [0, 128], sizes = [8, 64], strides = [1, 1]} : vector<8x256xf32> to vector<8x64xf32>
    %26 = vector.extract_strided_slice %22 {offsets = [0, 192], sizes = [8, 64], strides = [1, 1]} : vector<8x256xf32> to vector<8x64xf32>
    %c0_22 = arith.constant 0 : index
    %c0_23 = arith.constant 0 : index
    %27 = vector.load %arg3[%c0_22, %c0_23] : memref<8x32xf32, #tpu.memory_space<vmem>>, vector<8x32xf32>
    %c0_24 = arith.constant 0 : index
    %c0_25 = arith.constant 0 : index
    %28 = vector.load %arg6[%c0_24, %c0_25] : memref<8x32xf32, #tpu.memory_space<vmem>>, vector<8x32xf32>
    %29 = tpu.concatenate %27, %28 in 1 : vector<8x32xf32>, vector<8x32xf32> -> vector<8x64xf32>
    %30 = arith.mulf %24, %29 : vector<8x64xf32>
    %31 = arith.mulf %23, %25 : vector<8x64xf32>
    %32 = arith.addf %30, %31 : vector<8x64xf32>
    %33 = math.tanh %32 : vector<8x64xf32>
    %34 = arith.mulf %26, %33 : vector<8x64xf32>
    %35 = tpu.concatenate %34, %32 in 1 : vector<8x64xf32>, vector<8x64xf32> -> vector<8x128xf32>
    %c0_26 = arith.constant 0 : index
    %c0_27 = arith.constant 0 : index
    %36 = vector.load %arg12[%c0_26, %c0_27] : memref<8x128xf32, #tpu.memory_space<vmem>>, vector<8x128xf32>
    tpu.vector_store %arg12[%c0_26, %c0_27], %35 {strides = array<i32>} : memref<8x128xf32, #tpu.memory_space<vmem>>, vector<8x128xf32>,
    return
  }
  func.func @transform_0(%arg0: i32) -> (i32, i32) {
    %c0_i32 = arith.constant 0 : i32
    %c0_i32_0 = arith.constant 0 : i32
    return %arg0, %c0_i32 : i32, i32
  }
  func.func @transform_1(%arg0: i32) -> (i32, i32) {
    %c0_i32 = arith.constant 0 : i32
    %c0_i32_0 = arith.constant 0 : i32
    return %arg0, %c0_i32 : i32, i32
  }
  func.func @transform_2(%arg0: i32) -> (i32, i32) {
    %c0_i32 = arith.constant 0 : i32
    %c0_i32_0 = arith.constant 0 : i32
    return %arg0, %c0_i32 : i32, i32
  }
  func.func @transform_3(%arg0: i32) -> (i32, i32) {
    %c0_i32 = arith.constant 0 : i32
    %c0_i32_0 = arith.constant 0 : i32
    return %arg0, %c0_i32 : i32, i32
  }
  func.func @transform_4(%arg0: i32) -> (i32, i32) {
    %c0_i32 = arith.constant 0 : i32
    %c0_i32_0 = arith.constant 0 : i32
    return %arg0, %c0_i32 : i32, i32
  }
  func.func @transform_5(%arg0: i32) -> (i32, i32) {
    %c0_i32 = arith.constant 0 : i32
    %c0_i32_0 = arith.constant 0 : i32
    return %arg0, %c0_i32 : i32, i32
  }
  func.func @transform_6(%arg0: i32) -> (i32, i32) {
    %c0_i32 = arith.constant 0 : i32
    %c0_i32_0 = arith.constant 0 : i32
    %c0_i32_1 = arith.constant 0 : i32
    return %c0_i32, %c0_i32_0 : i32, i32
  }
  func.func @transform_7(%arg0: i32) -> (i32, i32) {
    %c0_i32 = arith.constant 0 : i32
    %c0_i32_0 = arith.constant 0 : i32
    %c0_i32_1 = arith.constant 0 : i32
    return %c0_i32, %c0_i32_0 : i32, i32
  }
  func.func @transform_8(%arg0: i32) -> (i32, i32) {
    %c0_i32 = arith.constant 0 : i32
    %c0_i32_0 = arith.constant 0 : i32
    %c0_i32_1 = arith.constant 0 : i32
    return %c0_i32, %c0_i32_0 : i32, i32
  }
  func.func @transform_9(%arg0: i32) -> (i32, i32) {
    %c0_i32 = arith.constant 0 : i32
    %c0_i32_0 = arith.constant 0 : i32
    %c0_i32_1 = arith.constant 0 : i32
    return %c0_i32, %c0_i32_0 : i32, i32
  }
  func.func @transform_10(%arg0: i32) -> (i32, i32) {
    %c0_i32 = arith.constant 0 : i32
    %c0_i32_0 = arith.constant 0 : i32
    %c0_i32_1 = arith.constant 0 : i32
    return %c0_i32, %c0_i32_0 : i32, i32
  }
  func.func @transform_11(%arg0: i32) -> (i32, i32) {
    %c0_i32 = arith.constant 0 : i32
    %c0_i32_0 = arith.constant 0 : i32
    return %arg0, %c0_i32 : i32, i32
  }
}

</mosaic_0001>

<bundles_post_ra>
// kernel: tpu_custom_call.1
= control target key start
LH: loop header
LB: loop body
LE: loop exit
PB: predicated region body
PF: predicated region fallthrough
CT: control target
= control target key end

     0   :  { %16 = vsyncpa [#allocation3], 0  ;;  %s1045_s0 = inlined_call_operand.hbm [shape: f32[8,16], index: 0, kind: input, shape index: {}]   ;;  %s1046_s1 = inlined_call_operand.hbm [shape: f32[8,32], index: 1, kind: input, shape index: {}]   ;;  %s1047_s2 = inlined_call_operand.hbm [shape: f32[8,32], index: 2, kind: input, shape index: {}]   ;;  %s1048_s3 = inlined_call_operand.vmem [shape: f32[8,12], index: 3, kind: input, shape index: {}]   ;;  %s1049_s4 = inlined_call_operand.hbm [shape: f32[8,32], index: 4, kind: input, shape index: {}]   ;;  %s1050_s5 = inlined_call_operand.vmem [shape: f32[8,32], index: 5, kind: input, shape index: {}]   ;;  %s1051_s6 = inlined_call_operand.hbm [shape: f32[16,256], index: 6, kind: input, shape index: {}]   ;;  %s1052_s7 = inlined_call_operand.hbm [shape: f32[32,256], index: 7, kind: input, shape index: {}]   ;;  %s1053_s8 = inlined_call_operand.hbm [shape: f32[12,256], index: 8, kind: input, shape index: {}]   ;;  %s1054_s9 = inlined_call_operand.hbm [shape: f32[32,256], index: 9, kind: input, shape index: {}]   ;;  %s1055_s10 = inlined_call_operand.vmem [shape: f32[1,256], index: 10, kind: input, shape index: {}]   ;;  %s1056_s11 = inlined_call_operand.hbm [shape: f32[8,128], index: 11, kind: output, shape index: {}]  }
   0x1   :  { %17 = vsyncpa [#allocation6], 0 }
   0x2   :  { %18 = vsyncpa [#allocation9], 0 }
   0x3   :  { %19 = vsyncpa [#allocation12], 0 }
   0x4   :  { %20 = vsyncpa [#allocation15], 0 }
   0x5   :  { %21 = vsyncpa [#allocation4], 0  ;;  %s813_s17 = smov [#allocation5]   ;;  %s814_s19 = smov [#allocation8]  }
   0x6   :  { %s38_s18 = sshll.u32 %s813_s17, 4  ;;  %s60_s20 = sshll.u32 %s814_s19, 4  ;;  %s39_s18 = int_to_ptr.vmem [resolvable:$true] %s38_s18  ;;  %s61_s20 = int_to_ptr.vmem [resolvable:$true] %s60_s20 }
   0x7   :  { %s603_s23 = scalar_lea.hbm %s1046_s1, 128 }
   0x8   :  { %p604_p0 = scmp.ne.s32.totalorder %s1046_s1, %s603_s23  ;;  %p607_p1 = scmp.lt.u32.totalorder %s603_s23, %s1046_s1 }
   0xa   :  { %p609_p2 = pnand %p607_p1, %p604_p0 }
   0xc   :  { %612 = shalt.err (!%p609_p2)
}
   0xd   :  { %s613_s28 = scalar_lea.vmem %s39_s18, 128  ;;  %p618_p4 = scmp.lt.s32.totalorder %s39_s18, %s39_s18 }
   0xe   :  { %p614_p3 = scmp.ne.s32.totalorder %s39_s18, %s613_s28  ;;  %p619_p5 = scmp.lt.s32.totalorder %s613_s28, %s613_s28 }
  0x10   :  { %p620_p6 = por %p619_p5, %p618_p4 }
  0x12   :  { %p621_p7 = pnand %p620_p6, %p614_p3 }
  0x14   :  { %624 = shalt.err (!%p621_p7)
}
  0x15   :  { %41 = dma.hbm_to_vmem [thread:$0]  %s1046_s1, 128, %s39_s18, [#allocation6]  }
  0x16   :  { %s625_s14 = scalar_lea.hbm %s1049_s4, 128 }
  0x17   :  { %p626_p8 = scmp.ne.s32.totalorder %s1049_s4, %s625_s14  ;;  %p629_p9 = scmp.lt.u32.totalorder %s625_s14, %s1049_s4 }
  0x19   :  { %p631_p10 = pnand %p629_p9, %p626_p8 }
  0x1b   :  { %634 = shalt.err (!%p631_p10)
}
  0x1c   :  { %s635_s21 = scalar_lea.vmem %s61_s20, 128  ;;  %p640_p12 = scmp.lt.s32.totalorder %s61_s20, %s61_s20 }
  0x1d   :  { %p636_p11 = scmp.ne.s32.totalorder %s61_s20, %s635_s21  ;;  %p641_p13 = scmp.lt.s32.totalorder %s635_s21, %s635_s21 }
  0x1f   :  { %p642_p0 = por %p641_p13, %p640_p12 }
  0x21   :  { %p643_p1 = pnand %p642_p0, %p636_p11 }
  0x23   :  { %646 = shalt.err (!%p643_p1)
}
  0x24   :  { %63 = dma.hbm_to_vmem [thread:$0]  %s1049_s4, 128, %s61_s20, [#allocation9]  }
  0x25   :  { %s815_s22 = smov [#allocation11]   ;;  %s816_s24 = smov [#allocation2]  }
  0x26   :  { %s83_s23 = sshll.u32 %s815_s22, 4  ;;  %s28_s25 = sshll.u32 %s816_s24, 4  ;;  %s84_s23 = int_to_ptr.vmem [resolvable:$true] %s83_s23  ;;  %s29_s25 = int_to_ptr.vmem [resolvable:$true] %s28_s25 }
  0x27   :  { %s647_s28 = scalar_lea.hbm %s1052_s7, 1024 }
  0x28   :  { %p648_p2 = scmp.ne.s32.totalorder %s1052_s7, %s647_s28  ;;  %p651_p3 = scmp.lt.u32.totalorder %s647_s28, %s1052_s7 }
  0x2a   :  { %p653_p4 = pnand %p651_p3, %p648_p2 }
  0x2c   :  { %656 = shalt.err (!%p653_p4)
}
  0x2d   :  { %s657_s4 = scalar_lea.vmem %s84_s23, 1024  ;;  %p662_p6 = scmp.lt.s32.totalorder %s84_s23, %s84_s23 }
  0x2e   :  { %p658_p5 = scmp.ne.s32.totalorder %s84_s23, %s657_s4  ;;  %p663_p7 = scmp.lt.s32.totalorder %s657_s4, %s657_s4 }
  0x30   :  { %p664_p8 = por %p663_p7, %p662_p6 }
  0x32   :  { %p665_p9 = pnand %p664_p8, %p658_p5 }
  0x34   :  { %668 = shalt.err (!%p665_p9)
}
  0x35   :  { %s817_s20 = smov 256   ;;  %s818_s14 = smov 16  }
  0x36   :  { %89 = dma.hbm_to_vmem [thread:$0]  %s1052_s7, 1024, %s84_s23, [#allocation12], %s817_s20, %s817_s20, %s818_s14  }
  0x37   :  { %s669_s21 = scalar_lea.hbm %s1045_s0, 128 }
  0x38   :  { %p670_p10 = scmp.ne.s32.totalorder %s1045_s0, %s669_s21  ;;  %p673_p11 = scmp.lt.u32.totalorder %s669_s21, %s1045_s0 }
  0x3a   :  { %p675_p12 = pnand %p673_p11, %p670_p10 }
  0x3c   :  { %678 = shalt.err (!%p675_p12)
}
  0x3d   :  { %s679_s26 = scalar_lea.vmem %s29_s25, 128  ;;  %p684_p0 = scmp.lt.s32.totalorder %s29_s25, %s29_s25 }
  0x3e   :  { %p680_p13 = scmp.ne.s32.totalorder %s29_s25, %s679_s26  ;;  %p685_p1 = scmp.lt.s32.totalorder %s679_s26, %s679_s26 }
  0x40   :  { %p686_p2 = por %p685_p1, %p684_p0 }
  0x42   :  { %p687_p3 = pnand %p686_p2, %p680_p13 }
  0x44   :  { %690 = shalt.err (!%p687_p3)
}
  0x45   :  { %31 = dma.hbm_to_vmem [thread:$0]  %s1045_s0, 128, %s29_s25, [#allocation3]  }
  0x46   :  { %s819_s27 = smov [#allocation7]   ;;  %s820_s29 = smov [#allocation10]  }
  0x47   :  { %s48_s28 = sshll.u32 %s819_s27, 4  ;;  %s71_s30 = sshll.u32 %s820_s29, 4  ;;  %s49_s28 = int_to_ptr.vmem [resolvable:$true] %s48_s28  ;;  %s939_s30 = int_to_ptr.vmem [resolvable:$true] %s71_s30 }
  0x48   :  { %s691_s4 = scalar_lea.hbm %s1047_s2, 128 }
  0x49   :  { %p692_p4 = scmp.ne.s32.totalorder %s1047_s2, %s691_s4  ;;  %p695_p5 = scmp.lt.u32.totalorder %s691_s4, %s1047_s2 }
  0x4b   :  { %p697_p6 = pnand %p695_p5, %p692_p4 }
  0x4d   :  { %700 = shalt.err (!%p697_p6)
}
  0x4e   :  { %s701_s0 = scalar_lea.vmem %s49_s28, 128  ;;  %p706_p8 = scmp.lt.s32.totalorder %s49_s28, %s49_s28 }
  0x4f   :  { %p702_p7 = scmp.ne.s32.totalorder %s49_s28, %s701_s0  ;;  %p707_p9 = scmp.lt.s32.totalorder %s701_s0, %s701_s0 }
  0x51   :  { %p708_p10 = por %p707_p9, %p706_p8 }
  0x53   :  { %p709_p11 = pnand %p708_p10, %p702_p7 }
  0x55   :  { %712 = shalt.err (!%p709_p11)
}
  0x56   :  { %51 = dma.hbm_to_vmem [thread:$0]  %s1047_s2, 128, %s49_s28, [#allocation6]  }
  0x57   :  { %s713_s22 = scalar_lea.hbm %s1051_s6, 512 }
  0x58   :  { %p714_p12 = scmp.ne.s32.totalorder %s1051_s6, %s713_s22  ;;  %p717_p13 = scmp.lt.u32.totalorder %s713_s22, %s1051_s6 }
  0x5a   :  { %p719_p0 = pnand %p717_p13, %p714_p12 }
  0x5c   :  { %722 = shalt.err (!%p719_p0)
}
  0x5d   :  { %s723_s27 = scalar_lea.vmem %s939_s30, 512  ;;  %p728_p2 = scmp.lt.s32.totalorder %s939_s30, %s939_s30 }
  0x5e   :  { %p724_p1 = scmp.ne.s32.totalorder %s939_s30, %s723_s27  ;;  %p729_p3 = scmp.lt.s32.totalorder %s723_s27, %s723_s27 }
  0x60   :  { %p730_p4 = por %p729_p3, %p728_p2 }
  0x62   :  { %p731_p5 = pnand %p730_p4, %p724_p1 }
  0x64   :  { %734 = shalt.err (!%p731_p5)
}
  0x65   :  { %77 = dma.hbm_to_vmem [thread:$0]  %s1051_s6, 512, %s939_s30, [#allocation9], %s817_s20, %s817_s20, %s818_s14  }
  0x66   :  { %s821_s29 = smov [#allocation13]   ;;  %s822_s13 = smov [#allocation14]  }
  0x67   :  { %s95_s12 = sshll.u32 %s821_s29, 4  ;;  %s107_s4 = sshll.u32 %s822_s13, 4  ;;  %s96_s12 = int_to_ptr.vmem [resolvable:$true] %s95_s12  ;;  %s973_s4 = int_to_ptr.vmem [resolvable:$true] %s107_s4 }
  0x68   :  { %s735_s17 = scalar_lea.hbm %s1053_s8, 512 }
  0x69   :  { %p736_p6 = scmp.ne.s32.totalorder %s1053_s8, %s735_s17  ;;  %p739_p7 = scmp.lt.u32.totalorder %s735_s17, %s1053_s8 }
  0x6b   :  { %p741_p8 = pnand %p739_p7, %p736_p6 }
  0x6d   :  { %744 = shalt.err (!%p741_p8)
}
  0x6e   :  { %s745_s6 = scalar_lea.vmem %s96_s12, 512  ;;  %p750_p10 = scmp.lt.s32.totalorder %s96_s12, %s96_s12 }
  0x6f   :  { %p746_p9 = scmp.ne.s32.totalorder %s96_s12, %s745_s6  ;;  %p751_p11 = scmp.lt.s32.totalorder %s745_s6, %s745_s6 }
  0x71   :  { %p752_p12 = por %p751_p11, %p750_p10 }
  0x73   :  { %p753_p13 = pnand %p752_p12, %p746_p9 }
  0x75   :  { %756 = shalt.err (!%p753_p13)
}
  0x76   :  { %101 = dma.hbm_to_vmem [thread:$0]  %s1053_s8, 512, %s96_s12, [#allocation12], %s817_s20, %s817_s20, %s818_s14  }
  0x77   :  { %s757_s24 = scalar_lea.hbm %s1054_s9, 1024 }
  0x78   :  { %p758_p0 = scmp.ne.s32.totalorder %s1054_s9, %s757_s24  ;;  %p761_p1 = scmp.lt.u32.totalorder %s757_s24, %s1054_s9 }
  0x7a   :  { %p763_p2 = pnand %p761_p1, %p758_p0 }
  0x7c   :  { %766 = shalt.err (!%p763_p2)
}
  0x7d   :  { %s767_s2 = scalar_lea.vmem %s973_s4, 1024  ;;  %p772_p4 = scmp.lt.s32.totalorder %s973_s4, %s973_s4 }
  0x7e   :  { %p768_p3 = scmp.ne.s32.totalorder %s973_s4, %s767_s2  ;;  %p773_p5 = scmp.lt.s32.totalorder %s767_s2, %s767_s2 }
  0x80   :  { %p774_p6 = por %p773_p5, %p772_p4 }
  0x82   :  { %p775_p7 = pnand %p774_p6, %p768_p3 }
  0x84   :  { %778 = shalt.err (!%p775_p7)
}
  0x85   :  { %113 = dma.hbm_to_vmem [thread:$0]  %s1054_s9, 1024, %s973_s4, [#allocation15], %s817_s20, %s817_s20, %s818_s14  }
  0x86   :  { %801 = dma.done.wait [#allocation3], 128  }
  0x87   :  { %802 = vsyncadd [#allocation3], 4294967168 }
  0x88   :  { %803 = dma.done.wait [#allocation6], 256  }
  0x89   :  { %804 = vsyncadd [#allocation6], 4294967040 }
  0x8a   :  { %805 = dma.done.wait [#allocation9], 640  }
  0x8b   :  { %806 = vsyncadd [#allocation9], 4294966656 }
  0x8c   :  { %807 = dma.done.wait [#allocation12], 1536  }
  0x8d   :  { %808 = vsyncadd [#allocation12], 4294965760 }
  0x8e   :  { %809 = dma.done.wait [#allocation15], 1024  }
  0x8f   :  { %810 = vsyncadd [#allocation15], 4294966272  ;;  %v823_v0 = vmov 0.0   ;;  %vm313_vm0 = vcmask 1043456   ;;  %vm824_vm1 = vmmov 1   ;;  %v147_v2 = vld [vmem:[#allocation11 + $0x8] sm:$0xff]  ;;  %v480_v46 = vlaneseq }
  0x90   :  { %384 = vmatprep.mubr.f32.mxu0 %v823_v0  ;;  %222 = vmatprep.mubr.f32.mxu1 %v823_v0  ;;  %vm1010_vm2 = vmpackc.low %vm313_vm0, %vm824_vm1  ;;  %v149_v3 = vld [vmem:[#allocation11 + $0x18] sm:$0xff]  ;;  %v306_v4 = vld [vmem:[#allocation13 + $0x8] sm:$0xff]  ;;  %vm309_vm3 = vcmask 97280   ;;  %vm154_vm4 = vcmask 261120   ;;  %s825_s29 = smov 32   ;;  %vm229_vm5 = vcmask 130048  }
  0x91   :  { %v550_v5 = vpack.c.bf16 %v149_v3, %v147_v2  ;;  %v308_v6 = vld [vmem:[#allocation13 + $0x18] sm:$0xf]  ;;  %v146_v7 = vld [vmem:[#allocation11] sm:$0xff]  ;;  %v148_v8 = vld [vmem:[#allocation11 + $0x10] sm:$0xff]  ;;  %v481_v47 = vshrl.u32 %v480_v46, 7  ;;  %vm522_vm6 = vcmask 523264  }
  0x92   :  { %v562_v9 = vpack.c.bf16 %v308_v6, %v306_v4  ;;  %v552_v10 = vpack.c.bf16 %v148_v8, %v146_v7  ;;  %v305_v11 = vld [vmem:[#allocation13] sm:$0xff]  ;;  %v307_v12 = vld [vmem:[#allocation13 + $0x10] sm:$0xf]  ;;  %v151_v13 = vld [vmem:[#allocation11 + $0x28] sm:$0xff] }
  0x93   :  { %551 = vmatprep.subr.bf16.mxu1 %v550_v5  ;;  %v565_v14 = vpack.c.bf16 %v307_v12, %v305_v11  ;;  %v153_v15 = vld [vmem:[#allocation11 + $0x38] sm:$0xff]  ;;  %v395_v16 = vld [vmem:[#allocation14 + $0x8] sm:$0xff]  ;;  %v150_v19 = vld [vmem:[#allocation11 + $0x20] sm:$0xff]  ;;  %v482_v48 = vsub.s32 0, %v481_v47  ;;  %v486_v51 = vsub.s32 1, %v481_v47 }
  0x94   :  { %564 = vmatprep.subr.msk.bf16.mxu0 %vm1010_vm2, %v562_v9  ;;  %553 = vmatpush1.bf16.msra.mxu1 %v552_v10  ;;  %v554_v17 = vpack.c.bf16 %v153_v15, %v151_v13  ;;  %v397_v18 = vld [vmem:[#allocation14 + $0x18] sm:$0xff]  ;;  %v152_v20 = vld [vmem:[#allocation11 + $0x30] sm:$0xff]  ;;  %v304_v21 = vld [vmem:[%s1048_s3] sm:$0xff] }
  0x95   :  { %567 = vmatpush1.bf16.msk.msra.mxu0 %vm1010_vm2, %v565_v14  ;;  %v568_v22 = vpack.c.bf16 %v397_v18, %v395_v16  ;;  %v556_v23 = vpack.c.bf16 %v152_v20, %v150_v19  ;;  %v394_v24 = vld [vmem:[#allocation14] sm:$0xff]  ;;  %v396_v25 = vld [vmem:[#allocation14 + $0x10] sm:$0xff]  ;;  %v142_v27 = vld [vmem:[#allocation10 + $0x8] sm:$0xff] }
  0x96   :  { %555 = vmatprep.subr.bf16.mxu1 %v554_v17  ;;  %v570_v26 = vpack.c.bf16 %v396_v25, %v394_v24  ;;  %v144_v28 = vld [vmem:[#allocation10 + $0x18] sm:$0xff]  ;;  %v399_v29 = vld [vmem:[#allocation14 + $0x28] sm:$0xff]  ;;  %v141_v32 = vld [vmem:[#allocation10] sm:$0xff] }
  0x97   :  { %569 = vmatprep.subr.bf16.mxu0 %v568_v22  ;;  %v558_v30 = vpack.c.bf16 %v144_v28, %v142_v27  ;;  %v401_v31 = vld [vmem:[#allocation14 + $0x38] sm:$0xff]  ;;  %v143_v33 = vld [vmem:[#allocation10 + $0x10] sm:$0xff]  ;;  %v145_v34 = vld [vmem:[#allocation5] sm:$0xff] }
  0x98   :  { %548 = vmatmul.mubr.msk.f32.vlgmr.msra.gmra.mrb[0].mxu0 %vm309_vm3, %v304_v21  ;;  %557 = vmatpush1.bf16.msra.mxu1 %v556_v23  ;;  %v572_v35 = vpack.c.bf16 %v401_v31, %v399_v29  ;;  %v560_v36 = vpack.c.bf16 %v143_v33, %v141_v32  ;;  %v398_v37 = vld [vmem:[#allocation14 + $0x20] sm:$0xff]  ;;  %v400_v38 = vld [vmem:[#allocation14 + $0x30] sm:$0xff]  ;;  %v393_v41 = vld [vmem:[#allocation8] sm:$0xff] }
  0x99   :  { %571 = vmatpush1.bf16.msra.mxu0 %v570_v26  ;;  %559 = vmatprep.subr.bf16.mxu1 %v558_v30  ;;  %v574_v39 = vpack.c.bf16 %v400_v38, %v398_v37  ;;  %v499_v40 = vld [vmem:[%s1050_s5] sm:$0xff]  ;;  %v498_v43 = vld [vmem:[#allocation7] sm:$0xff]  ;;  %s826_s5 = smov 64  }
  0x9a   :  { %573 = vmatprep.subr.bf16.mxu0 %v572_v35  ;;  %469 = vmatprep.mubr.f32.mxu0 %v823_v0  ;;  %v140_v42 = vld [vmem:[#allocation2] sm:$0xff] }
  0x9b   :  { %544 = vmatmul.mubr.msk.f32.vlgmr.msra.gmra.mrb[0].mxu1 %vm154_vm4, %v145_v34  ;;  %501 = vrot.lane.b32.xlu0 %v499_v40, %s825_s29  ;;  %v478_v49 = vld [vmem:[%s1055_s10] sm:$0x3]  ;;  %s827_s10 = smov [#allocation16]  }
  0x9c   :  { %561 = vmatpush1.bf16.msra.mxu1 %v560_v36  ;;  %297 = vmatprep.mubr.f32.mxu1 %v823_v0  ;;  %v483_v53 = vrot.slane %v478_v49, %v482_v48  ;;  %v487_v57 = vrot.slane %v478_v49, %v486_v51  ;;  %s531_s4 = sshll.u32 %s827_s10, 4  ;;  %s532_s4 = int_to_ptr.vmem [resolvable:$true] %s531_s4 }
  0x9d   :  { %575 = vmatpush1.bf16.msra.mxu0 %v574_v39  ;;  %s779_s15 = scalar_lea.vmem %s532_s4, 128  ;;  %p784_p9 = scmp.lt.s32.totalorder %s532_s4, %s532_s4 }
  0x9e   :  { %p780_p8 = scmp.ne.s32.totalorder %s532_s4, %s779_s15  ;;  %p785_p10 = scmp.lt.s32.totalorder %s779_s15, %s779_s15 }
  0xa0   :  { %549 = vmatmul.mubr.msk.f32.vlgmr.msra.gmra.mrb[0].mxu0 %vm154_vm4, %v393_v41  ;;  %p786_p11 = por %p785_p10, %p784_p9 }
  0xa2   :  { %p787_p12 = pnand %p786_p11, %p780_p8 }
  0xa3   :  { %545 = vmatmul.mubr.msk.f32.vlgmr.msra.gmra.mrb[0].mxu1 %vm229_vm5, %v140_v42 }
 0x10d   :  { %v502_v44 = vpop.permute.xlu0 %501 }
 0x10e   :  { %v504_v45 = vsel %vm154_vm4, %v498_v43, %v502_v44 }
 0x10f   :  { %506 = vrot.lane.b32.xlu0 %v504_v45, %s826_s5 }
 0x173   :  { %v471_v50 = vpop.f32.mrb[0].mxu0 }
 0x174   :  { %v473_v52 = vpop.f32.mrb[1].mxu0 }
 0x176   :  { %v299_v54 = vpop.f32.mrb[0].mxu1 }
 0x177   :  { %v576_v55 = vadd.f32 %v471_v50, %v299_v54  ;;  %v301_v56 = vpop.f32.mrb[1].mxu1 }
 0x178   :  { %v577_v58 = vadd.f32 %v473_v52, %v301_v56 }
 0x179   :  { %v490_v59 = vadd.f32 %v576_v55, %v483_v53 }
 0x17a   :  { %v491_v60 = vadd.f32 %v577_v58, %v487_v57 }
 0x17b   :  { %597 = vtanh.f32 %v490_v59 }
 0x17c   :  { %599 = vtanh.f32 %v491_v60 }
 0x181   :  { %v507_v2 = vpop.permute.xlu0 %506 }
 0x185   :  { %v598_v61 = vpop.eup %597 }
 0x186   :  { %v494_v62 = vmul.f32 0.5, %v598_v61  ;;  %v600_v0 = vpop.eup %599 }
 0x187   :  { %v495_v6 = vmul.f32 0.5, %v600_v0 }
 0x188   :  { %v496_v63 = vadd.f32 0.5, %v494_v62 }
 0x189   :  { %v497_v7 = vadd.f32 0.5, %v495_v6 }
 0x18a   :  { %v510_v1 = vmul.f32 %v600_v0, %v496_v63  ;;  %v509_v3 = vmul.f32 %v507_v2, %v496_v63 }
 0x18c   :  { %512 = vrot.lane.b32.xlu1 %v510_v1, %s826_s5 }
 0x1fe   :  { %v513_v4 = vpop.permute.xlu1 %512 }
 0x1ff   :  { %v515_v5 = vadd.f32 %v513_v4, %v509_v3 }
 0x201   :  { %601 = vtanh.f32 %v515_v5 }
 0x20b   :  { %v602_v8 = vpop.eup %601 }
 0x20c   :  { %v517_v9 = vmul.f32 %v602_v8, %v497_v7 }
 0x20e   :  { %519 = vrot.lane.b32.xlu1 %v517_v9, %s826_s5 }
 0x280   :  { %v520_v10 = vpop.permute.xlu1 %519 }
 0x281   :  { %v523_v11 = vsel %vm522_vm6, %v520_v10, %v515_v5 }
 0x282   :  { %524 = vst [vmem:[#allocation16] sm:$0xff] %v523_v11 }
 0x283   :  { %790 = shalt.err (!%p787_p12)
}
 0x284   :  { %s791_s19 = scalar_lea.hbm %s1056_s11, 128 }
 0x285   :  { %p792_p13 = scmp.ne.s32.totalorder %s1056_s11, %s791_s19  ;;  %p795_p0 = scmp.lt.u32.totalorder %s791_s19, %s1056_s11 }
 0x287   :  { %p797_p1 = pnand %p795_p0, %p792_p13 }
 0x289   :  { %800 = shalt.err (!%p797_p1)
}
 0x28a   :  { %534 = dma.vmem_to_hbm [thread:$0]  %s532_s4, 128, %s1056_s11, [#allocation4]  }
 0x28b   :  { %811 = dma.done.wait [#allocation4], 128  }
 0x28c   :  { %812 = vsyncadd [#allocation4], 4294967168 }
 0x28d   :  { %538 = vsyncpa [#allocation3], 1 }
 0x28e   :  { %539 = vsyncpa [#allocation6], 1 }
 0x28f   :  { %540 = vsyncpa [#allocation9], 1 }
 0x290   :  { %541 = vsyncpa [#allocation12], 1 }
 0x291   :  { %542 = vsyncpa [#allocation15], 1 }
 0x292   :  { %543 = vsyncpa [#allocation4], 1 }

</bundles_post_ra>
